<compile_context>
chip_gen: v7x
topology: tpu7x:2x2x1
jax: 0.10.0
libtpu: 0.0.40
codegen_flags: <defaults>
</compile_context>

<pallas_src>
import jax
import jax.numpy as jnp
from jax.experimental import pallas as pl
from jax.experimental.pallas import tpu as pltpu


def _round_up(n, m):
    return ((n + m - 1) // m) * m


# ----------------------------------------------------------------------------
# Fused SplitMLP kernel: relu(relu(relu(x@w1+b1)@w2+b2)@w3+b3)
# ----------------------------------------------------------------------------
def _split_mlp_kernel(x_ref, w1_ref, b1_ref, w2_ref, b2_ref, w3_ref, b3_ref,
                      o_ref):
    h = jnp.dot(x_ref[...], w1_ref[...], preferred_element_type=jnp.float32)
    h = jnp.maximum(h + b1_ref[...], 0.0)
    h = jnp.dot(h, w2_ref[...], preferred_element_type=jnp.float32)
    h = jnp.maximum(h + b2_ref[...], 0.0)
    y = jnp.dot(h, w3_ref[...], preferred_element_type=jnp.float32)
    y = jnp.maximum(y + b3_ref[...], 0.0)        # SplitMLP output_activation=ReLU
    o_ref[...] = y.astype(o_ref.dtype)


def strive_prior_forward(params, inputs, *, latent_dim, tile_rows=512):
    """STRIVEPrior.forward.

    inputs: [..., condition_dim]  ->  {'mu': [..., L], 'logvar': [..., L]}
    """
    w1, b1 = params["w1"], params["b1"]
    w2, b2 = params["w2"], params["b2"]
    w3, b3 = params["w3"], params["b3"]

    lead = inputs.shape[:-1]
    Din = inputs.shape[-1]
    H1 = w1.shape[1]
    H2 = w2.shape[1]
    Dout = w3.shape[1]
    assert Dout == 2 * latent_dim

    x = inputs.reshape(-1, Din).astype(jnp.float32)
    N = x.shape[0]

    # Row tile: multiple of 8 sublanes, capped at tile_rows; pad N up to a
    # multiple of it so every grid step sees a full block (padded rows are
    # discarded at the end).
    TM = min(_round_up(tile_rows, 8), _round_up(N, 8))
    Np = _round_up(N, TM)
    if Np != N:
        x = jnp.pad(x, ((0, Np - N), (0, 0)))
    grid = (Np // TM,)

    out = pl.pallas_call(
        _split_mlp_kernel,
        out_shape=jax.ShapeDtypeStruct((Np, Dout), jnp.float32),
        grid=grid,
        in_specs=[
            pl.BlockSpec((TM, Din), lambda i: (i, 0)),   # activations: row-tiled
            pl.BlockSpec((Din, H1), lambda i: (0, 0)),   # weights/biases: resident
            pl.BlockSpec((1, H1), lambda i: (0, 0)),
            pl.BlockSpec((H1, H2), lambda i: (0, 0)),
            pl.BlockSpec((1, H2), lambda i: (0, 0)),
            pl.BlockSpec((H2, Dout), lambda i: (0, 0)),
            pl.BlockSpec((1, Dout), lambda i: (0, 0)),
        ],
        out_specs=pl.BlockSpec((TM, Dout), lambda i: (i, 0)),
        compiler_params=pltpu.CompilerParams(
            dimension_semantics=("parallel",)),
    )(x, w1, b1.reshape(1, H1), w2, b2.reshape(1, H2), w3, b3.reshape(1, Dout))

    out = out[:N]
    mu = out[:, :latent_dim].reshape(*lead, latent_dim)
    logvar = out[:, latent_dim:].reshape(*lead, latent_dim)
    return {"mu": mu, "logvar": logvar}


# ----------------------------------------------------------------------------
# Parameter construction (matches SplitMLP layer structure)
# ----------------------------------------------------------------------------
def init_params(key, *, condition_dim, layer_dims, latent_dim, scale=0.1):
    assert len(layer_dims) == 2
    H1, H2 = layer_dims
    Dout = 2 * latent_dim
    k1, k2, k3 = jax.random.split(key, 3)

    def w(k, shape):
        return scale * jax.random.normal(k, shape, dtype=jnp.float32)

    return dict(
        w1=w(k1, (condition_dim, H1)), b1=jnp.zeros((H1,), jnp.float32),
        w2=w(k2, (H1, H2)),            b2=jnp.zeros((H2,), jnp.float32),
        w3=w(k3, (H2, Dout)),          b3=jnp.zeros((Dout,), jnp.float32),
    )


# ----------------------------------------------------------------------------
if __name__ == "__main__":
    condition_dim = 32
    latent_dim = 64          # -> output slab width 128 (lane-dense)
    layer_dims = (128, 128)
    B = 16

    root = jax.random.PRNGKey(0)
    kp, kx = jax.random.split(root, 2)

    params = init_params(kp, condition_dim=condition_dim,
                         layer_dims=layer_dims, latent_dim=latent_dim)
    inputs = jax.random.normal(kx, (B, condition_dim), dtype=jnp.float32)

    # tile_rows=8 -> grid=(2,) so the 'parallel' axis has >1 step even at this
    # toy size; production sizes use the 512-row default.
    out = strive_prior_forward(params, inputs, latent_dim=latent_dim,
                               tile_rows=8)
    jax.block_until_ready(out)

    # Pure-JAX reference of the same forward pass.
    def ref_forward(x):
        h = jnp.maximum(x @ params["w1"] + params["b1"], 0.0)
        h = jnp.maximum(h @ params["w2"] + params["b2"], 0.0)
        y = jnp.maximum(h @ params["w3"] + params["b3"], 0.0)
        return y[:, :latent_dim], y[:, latent_dim:]

    mu_ref, logvar_ref = ref_forward(inputs)

    assert out["mu"].shape == (B, latent_dim)
    assert out["logvar"].shape == (B, latent_dim)
    assert bool(jnp.all(jnp.isfinite(out["mu"])))
    assert bool(jnp.all(jnp.isfinite(out["logvar"])))
    assert bool(jnp.allclose(out["mu"], mu_ref, atol=1e-2, rtol=1e-2))
    assert bool(jnp.allclose(out["logvar"], logvar_ref, atol=1e-2, rtol=1e-2))
    print("KERNEL_OK")
</pallas_src>

<mosaic_0001>
module attributes {stable_mosaic.version = 11 : i64} {
  func.func @_split_mlp_kernel(%arg0: i32, %arg1: memref<8x32xf32, #tpu.memory_space<vmem>>, %arg2: memref<32x128xf32, #tpu.memory_space<vmem>>, %arg3: memref<1x128xf32, #tpu.memory_space<vmem>>, %arg4: memref<128x128xf32, #tpu.memory_space<vmem>>, %arg5: memref<1x128xf32, #tpu.memory_space<vmem>>, %arg6: memref<128x128xf32, #tpu.memory_space<vmem>>, %arg7: memref<1x128xf32, #tpu.memory_space<vmem>>, %arg8: memref<8x128xf32, #tpu.memory_space<vmem>>) attributes {dimension_semantics = [#tpu.dimension_semantics<parallel>], iteration_bounds = array<i64: 2>, scalar_prefetch = 0 : i64, scratch_operands = 0 : i64, tpu.core_type = #tpu.core_type<tc>, window_params = [{transform_indices = @transform_0, window_bounds = array<i64: 8, 32>}, {pipeline_mode = #tpu.pipeline_mode<synchronous>, transform_indices = @transform_1, window_bounds = array<i64: 32, 128>}, {pipeline_mode = #tpu.pipeline_mode<synchronous>, transform_indices = @transform_2, window_bounds = array<i64: 1, 128>}, {pipeline_mode = #tpu.pipeline_mode<synchronous>, transform_indices = @transform_3, window_bounds = array<i64: 128, 128>}, {pipeline_mode = #tpu.pipeline_mode<synchronous>, transform_indices = @transform_4, window_bounds = array<i64: 1, 128>}, {pipeline_mode = #tpu.pipeline_mode<synchronous>, transform_indices = @transform_5, window_bounds = array<i64: 128, 128>}, {pipeline_mode = #tpu.pipeline_mode<synchronous>, transform_indices = @transform_6, window_bounds = array<i64: 1, 128>}, {transform_indices = @transform_7, window_bounds = array<i64: 8, 128>}]} {
    %c0 = arith.constant 0 : index
    %c0_0 = arith.constant 0 : index
    %0 = vector.load %arg1[%c0, %c0_0] : memref<8x32xf32, #tpu.memory_space<vmem>>, vector<8x32xf32>
    %c0_1 = arith.constant 0 : index
    %c0_2 = arith.constant 0 : index
    %1 = vector.load %arg2[%c0_1, %c0_2] : memref<32x128xf32, #tpu.memory_space<vmem>>, vector<32x128xf32>
    %cst = arith.constant dense<0.000000e+00> : vector<8x128xf32>
    %2 = tpu.matmul %0, %1, %cst {dimension_numbers = #tpu.dot_dimension_numbers<[1], [0], [0], [1], [0, 0, 1, 1], [], []>} : vector<8x32xf32>, vector<32x128xf32>, vector<8x128xf32> -> vector<8x128xf32>
    %c0_3 = arith.constant 0 : index
    %c0_4 = arith.constant 0 : index
    %3 = vector.load %arg3[%c0_3, %c0_4] : memref<1x128xf32, #tpu.memory_space<vmem>>, vector<1x128xf32>
    %4 = vector.broadcast %3 : vector<1x128xf32> to vector<8x128xf32>
    %5 = arith.addf %2, %4 : vector<8x128xf32>
    %cst_5 = arith.constant 0.000000e+00 : f32
    %6 = vector.broadcast %cst_5 : f32 to vector<8x128xf32>
    %7 = arith.maximumf %5, %6 : vector<8x128xf32>
    %c0_6 = arith.constant 0 : index
    %c0_7 = arith.constant 0 : index
    %8 = vector.load %arg4[%c0_6, %c0_7] : memref<128x128xf32, #tpu.memory_space<vmem>>, vector<128x128xf32>
    %cst_8 = arith.constant dense<0.000000e+00> : vector<8x128xf32>
    %9 = tpu.matmul %7, %8, %cst_8 {dimension_numbers = #tpu.dot_dimension_numbers<[1], [0], [0], [1], [0, 0, 1, 1], [], []>} : vector<8x128xf32>, vector<128x128xf32>, vector<8x128xf32> -> vector<8x128xf32>
    %c0_9 = arith.constant 0 : index
    %c0_10 = arith.constant 0 : index
    %10 = vector.load %arg5[%c0_9, %c0_10] : memref<1x128xf32, #tpu.memory_space<vmem>>, vector<1x128xf32>
    %11 = vector.broadcast %10 : vector<1x128xf32> to vector<8x128xf32>
    %12 = arith.addf %9, %11 : vector<8x128xf32>
    %cst_11 = arith.constant 0.000000e+00 : f32
    %13 = vector.broadcast %cst_11 : f32 to vector<8x128xf32>
    %14 = arith.maximumf %12, %13 : vector<8x128xf32>
    %c0_12 = arith.constant 0 : index
    %c0_13 = arith.constant 0 : index
    %15 = vector.load %arg6[%c0_12, %c0_13] : memref<128x128xf32, #tpu.memory_space<vmem>>, vector<128x128xf32>
    %cst_14 = arith.constant dense<0.000000e+00> : vector<8x128xf32>
    %16 = tpu.matmul %14, %15, %cst_14 {dimension_numbers = #tpu.dot_dimension_numbers<[1], [0], [0], [1], [0, 0, 1, 1], [], []>} : vector<8x128xf32>, vector<128x128xf32>, vector<8x128xf32> -> vector<8x128xf32>
    %c0_15 = arith.constant 0 : index
    %c0_16 = arith.constant 0 : index
    %17 = vector.load %arg7[%c0_15, %c0_16] : memref<1x128xf32, #tpu.memory_space<vmem>>, vector<1x128xf32>
    %18 = vector.broadcast %17 : vector<1x128xf32> to vector<8x128xf32>
    %19 = arith.addf %16, %18 : vector<8x128xf32>
    %cst_17 = arith.constant 0.000000e+00 : f32
    %20 = vector.broadcast %cst_17 : f32 to vector<8x128xf32>
    %21 = arith.maximumf %19, %20 : vector<8x128xf32>
    %c0_18 = arith.constant 0 : index
    %c0_19 = arith.constant 0 : index
    %22 = vector.load %arg8[%c0_18, %c0_19] : memref<8x128xf32, #tpu.memory_space<vmem>>, vector<8x128xf32>
    tpu.vector_store %arg8[%c0_18, %c0_19], %21 {strides = array<i32>} : memref<8x128xf32, #tpu.memory_space<vmem>>, vector<8x128xf32>,
    return
  }
  func.func @transform_0(%arg0: i32) -> (i32, i32) {
    %c0_i32 = arith.constant 0 : i32
    %c0_i32_0 = arith.constant 0 : i32
    return %arg0, %c0_i32 : i32, i32
  }
  func.func @transform_1(%arg0: i32) -> (i32, i32) {
    %c0_i32 = arith.constant 0 : i32
    %c0_i32_0 = arith.constant 0 : i32
    %c0_i32_1 = arith.constant 0 : i32
    return %c0_i32, %c0_i32_0 : i32, i32
  }
  func.func @transform_2(%arg0: i32) -> (i32, i32) {
    %c0_i32 = arith.constant 0 : i32
    %c0_i32_0 = arith.constant 0 : i32
    %c0_i32_1 = arith.constant 0 : i32
    return %c0_i32, %c0_i32_0 : i32, i32
  }
  func.func @transform_3(%arg0: i32) -> (i32, i32) {
    %c0_i32 = arith.constant 0 : i32
    %c0_i32_0 = arith.constant 0 : i32
    %c0_i32_1 = arith.constant 0 : i32
    return %c0_i32, %c0_i32_0 : i32, i32
  }
  func.func @transform_4(%arg0: i32) -> (i32, i32) {
    %c0_i32 = arith.constant 0 : i32
    %c0_i32_0 = arith.constant 0 : i32
    %c0_i32_1 = arith.constant 0 : i32
    return %c0_i32, %c0_i32_0 : i32, i32
  }
  func.func @transform_5(%arg0: i32) -> (i32, i32) {
    %c0_i32 = arith.constant 0 : i32
    %c0_i32_0 = arith.constant 0 : i32
    %c0_i32_1 = arith.constant 0 : i32
    return %c0_i32, %c0_i32_0 : i32, i32
  }
  func.func @transform_6(%arg0: i32) -> (i32, i32) {
    %c0_i32 = arith.constant 0 : i32
    %c0_i32_0 = arith.constant 0 : i32
    %c0_i32_1 = arith.constant 0 : i32
    return %c0_i32, %c0_i32_0 : i32, i32
  }
  func.func @transform_7(%arg0: i32) -> (i32, i32) {
    %c0_i32 = arith.constant 0 : i32
    %c0_i32_0 = arith.constant 0 : i32
    return %arg0, %c0_i32 : i32, i32
  }
}

</mosaic_0001>

<bundles_post_ra>
// kernel: tpu_custom_call.1
= control target key start
LH: loop header
LB: loop body
LE: loop exit
PB: predicated region body
PF: predicated region fallthrough
CT: control target
= control target key end

     0   :  { %12 = vsyncpa [#allocation3], 0  ;;  %s1545_s0 = inlined_call_operand.hbm [shape: f32[16,32], index: 0, kind: input, shape index: {}]   ;;  %s1546_s1 = inlined_call_operand.hbm [shape: f32[32,128], index: 1, kind: input, shape index: {}]   ;;  %s1547_s2 = inlined_call_operand.vmem [shape: f32[1,128], index: 2, kind: input, shape index: {}]   ;;  %s1548_s3 = inlined_call_operand.hbm [shape: f32[128,128], index: 3, kind: input, shape index: {}]   ;;  %s1549_s4 = inlined_call_operand.vmem [shape: f32[1,128], index: 4, kind: input, shape index: {}]   ;;  %s1550_s5 = inlined_call_operand.hbm [shape: f32[128,128], index: 5, kind: input, shape index: {}]   ;;  %s1551_s6 = inlined_call_operand.vmem [shape: f32[1,128], index: 6, kind: input, shape index: {}]   ;;  %s1552_s7 = inlined_call_operand.hbm [shape: f32[16,128], index: 7, kind: output, shape index: {}]  }
   0x1   :  { %14 = vsyncpa [#allocation3 + $0x1], 0 }
   0x2   :  { %15 = vsyncpa [#allocation6], 0 }
   0x3   :  { %16 = vsyncpa [#allocation9], 0 }
   0x4   :  { %17 = vsyncpa [#allocation4], 0 }
   0x5   :  { %19 = vsyncpa [#allocation4 + $0x1], 0  ;;  %s1245_s24 = smov 0   ;;  %s1247_s25 = smov 0  }
   0x6   :  { %s1249_s26 = smov 0   ;;  %s1251_s27 = smov 0  }
   0x7 LB: > { %s1266_s28 = sadd.s32 4294967295, %s1193_s27   ;;  %s727_s29 = sadd.s32 4294967294, %s1193_s27   ;;  %s1193_s27 = sphi %s1251_s27, %s1578_s27   ;;  %s1189_s26 = sphi %s1249_s26, %s1577_s26   ;;  %s1185_s25 = sphi %s1247_s25, %s1576_s25   ;;  %s1181_s24 = sphi %s1245_s24, %s1575_s24  }
   0x8   : > { %p45_p0 = scmp.ne.s32.totalorder %s1185_s25, %s1181_s24  ;;  %p1553_p1 = scmp.eq.s32.totalorder %s1266_s28, 0 }
   0x9   : > { %p201_p3 = scmp.eq.s32.totalorder %s727_s29, 1  ;;  %p728_p5 = scmp.ge.s32.totalorder %s1193_s27, 1 }
   0xa   : > { %p1275_p4 = por %p1553_p1, %p45_p0  ;;  %p208_p7 = scmp.lt.s32.totalorder %s1193_s27, 3 }
   0xb   : > { %p1280_p6 = por %p201_p3, %p45_p0  ;;  %s1195_s10 = smov [#allocation5]  }
   0xc   : > { %s1557_s30 = scalar_select %p1275_p4, 1, 0 }
   0xd   : > { %s1558_s8 = scalar_select %p1280_p6, 1, 0 }
   0xe   : > { %p1285_p8 = pnand %p728_p5, %p208_p7  ;;  %s220_s11 = sshll.u32 %s1195_s10, 4  ;;  %s1289_s11 = int_to_ptr.vmem [resolvable:$true] %s220_s11 }
   0xf   : > { %1559 = sst [smem:[#allocation15_spill]] %s1558_s8  ;;  %s1196_s13 = smov [#allocation7]  }
  0x10   : > { %s1560_s9 = scalar_select %p1285_p8, 1, 0 }
  0x11   : > { %p939_p9 = pneg %p1285_p8  ;;  %s236_s14 = sshll.u32 %s1196_s13, 4  ;;  %s1300_s14 = int_to_ptr.vmem [resolvable:$true] %s236_s14 }
  0x12   : > { %s1197_s15 = smov [#allocation8]   ;;  %s1005_s19 = scalar_lea.hbm %s1546_s1, 512 }
  0x13   : > { %p1296_p11 = pnand %p939_p9, %p1553_p1  ;;  %s1302_s16 = sshll.u32 %s1197_s15, 4  ;;  %s253_s16 = int_to_ptr.vmem [resolvable:$true] %s1302_s16 }
  0x14   : > { %p1006_p12 = scmp.ne.s32.totalorder %s1546_s1, %s1005_s19  ;;  %p1012_p5 = scmp.lt.u32.totalorder %s1005_s19, %s1546_s1 }
  0x15   : > { %p1312_p13 = pneg %p1296_p11 }
  0x17   : > { %p1008_p0 = pnand %p1312_p13, %p1006_p12 }
  0x19   : > { %p1009_p3 = pneg %p1008_p0 }
  0x1b   : > { %p1014_p7 = pnand %p1012_p5, %p1009_p3 }
  0x1d   : > { %1017 = shalt.err (!%p1014_p7)
}
  0x1e   : > { %s1018_s10 = scalar_lea.vmem %s1289_s11, 512  ;;  %p1026_p2 = scmp.lt.s32.totalorder %s1289_s11, %s1289_s11 }
  0x1f   : > { %p1019_p9 = scmp.ne.s32.totalorder %s1289_s11, %s1018_s10  ;;  %p1027_p6 = scmp.lt.s32.totalorder %s1018_s10, %s1018_s10 }
  0x21   : > { %p1021_p10 = pnand %p1019_p9, %p1312_p13  ;;  %p1028_p12 = por %p1027_p6, %p1026_p2 }
  0x23   : > { %p1022_p1 = pneg %p1021_p10 }
  0x25   : > { %p1029_p0 = pnand %p1028_p12, %p1022_p1 }
  0x27   : > { %1032 = shalt.err (!%p1029_p0)
}
  0x28   : > { %s1198_s13 = smov 128   ;;  %s1199_s15 = smov 8  }
  0x29   : > { %942 = dma.hbm_to_vmem [thread:$0]  (!%p1296_p11), %s1546_s1, 512, %s1289_s11, [#allocation6], %s1198_s13, %s1198_s13, %s1199_s15  }
  0x2a   : > { %s1033_s21 = scalar_lea.hbm %s1548_s3, 2048 }
  0x2b   : > { %p1034_p1 = scmp.ne.s32.totalorder %s1548_s3, %s1033_s21  ;;  %p1040_p10 = scmp.lt.u32.totalorder %s1033_s21, %s1548_s3 }
  0x2d   : > { %p1036_p2 = pnand %p1034_p1, %p1312_p13 }
  0x2f   : > { %p1037_p6 = pneg %p1036_p2 }
  0x31   : > { %p1042_p3 = pnand %p1040_p10, %p1037_p6 }
  0x33   : > { %1045 = shalt.err (!%p1042_p3)
}
  0x34   : > { %s1046_s11 = scalar_lea.vmem %s1300_s14, 2048  ;;  %p1054_p12 = scmp.lt.s32.totalorder %s1300_s14, %s1300_s14 }
  0x35   : > { %p1047_p5 = scmp.ne.s32.totalorder %s1300_s14, %s1046_s11  ;;  %p1055_p0 = scmp.lt.s32.totalorder %s1046_s11, %s1046_s11 }
  0x37   : > { %p1049_p7 = pnand %p1047_p5, %p1312_p13  ;;  %p1056_p1 = por %p1055_p0, %p1054_p12 }
  0x39   : > { %p1050_p9 = pneg %p1049_p7 }
  0x3b   : > { %p1057_p2 = pnand %p1056_p1, %p1050_p9 }
  0x3d   : > { %1060 = shalt.err (!%p1057_p2)
}
  0x3e   : > { %945 = dma.hbm_to_vmem [thread:$0]  (!%p1296_p11), %s1548_s3, 2048, %s1300_s14, [#allocation6], %s1198_s13, %s1198_s13, %s1199_s15  }
  0x3f   : > { %s1061_s20 = scalar_lea.hbm %s1550_s5, 2048 }
  0x40   : > { %p1062_p6 = scmp.ne.s32.totalorder %s1550_s5, %s1061_s20  ;;  %p1068_p5 = scmp.lt.u32.totalorder %s1061_s20, %s1550_s5 }
  0x42   : > { %p1064_p10 = pnand %p1062_p6, %p1312_p13 }
  0x44   : > { %p1065_p3 = pneg %p1064_p10 }
  0x46   : > { %p1070_p7 = pnand %p1068_p5, %p1065_p3 }
  0x48   : > { %1073 = shalt.err (!%p1070_p7)
}
  0x49   : > { %s1074_s11 = scalar_lea.vmem %s253_s16, 2048  ;;  %p1082_p1 = scmp.lt.s32.totalorder %s253_s16, %s253_s16 }
  0x4a   : > { %p1075_p9 = scmp.ne.s32.totalorder %s253_s16, %s1074_s11  ;;  %p1083_p2 = scmp.lt.s32.totalorder %s1074_s11, %s1074_s11 }
  0x4c   : > { %p1077_p12 = pnand %p1075_p9, %p1312_p13  ;;  %p1084_p4 = por %p1083_p2, %p1082_p1 }
  0x4e   : > { %p1078_p0 = pneg %p1077_p12 }
  0x50   : > { %p1085_p8 = pnand %p1084_p4, %p1078_p0 }
  0x52   : > { %1088 = shalt.err (!%p1085_p8)
}
  0x53   : > { %948 = dma.hbm_to_vmem [thread:$0]  (!%p1296_p11), %s1550_s5, 2048, %s253_s16, [#allocation9], %s1198_s13, %s1198_s13, %s1199_s15  }
  0x54   : > { %s1385_s22 = sadd.s32 1, %s1193_s27   ;;  %s32_s17 = sadd.s32 1, %s1189_s26 }
  0x55   : > { %s29_s12 = ssub.s32 %s1193_s27, %s1385_s22  ;;  %p39_p8 = scmp.ne.s32.totalorder %s1189_s26, %s1185_s25 }
  0x56   : > { %p30_p4 = scmp.eq.s32.totalorder %s29_s12, 0  ;;  %p40_p13 = scmp.eq.s32.totalorder %s1193_s27, 0 }
  0x57   : > { %p960_p6 = scmp.lt.s32.totalorder %s1193_s27, 2  ;;  %p1563_p3 = scmp.eq.s32.totalorder %s1266_s28, 1 }
  0x58   : > { %s1395_s18 = scalar_select %p30_p4, %s1189_s26, %s32_s17  }
  0x59   : > { %p41_p10 = por %p40_p13, %p39_p8  ;;  %p1399_p5 = por %p1563_p3, %p39_p8 }
  0x5a   : > { %s269_s20 = sand.u32 1, %s1189_s26   ;;  %s734_s21 = sshll.u32 %s1193_s27, 7 }
  0x5b   : > { %s733_s16 = sshll.u32 %s269_s20, 3  ;;  %s1408_s23 = scalar_lea.hbm %s1545_s0, %s734_s21 }
  0x5c   : > { %s273_s29 = scalar_lea.vmem [#allocation2], %s733_s16  ;;  %p1410_p11 = pnand %p960_p6, %p41_p10 }
  0x5d   : > { %s280_s10 = sshll.u32 %s273_s29, 4  ;;  %s270_s14 = scalar_lea.sflag [#allocation3], %s269_s20  ;;  %s1414_s10 = int_to_ptr.vmem [resolvable:$true] %s280_s10 }
  0x5e   : > { %s1089_s8 = scalar_lea.hbm %s1408_s23, 128  ;;  %p1091_p9 = pneg %p1410_p11 }
  0x5f   : > { %p1090_p7 = scmp.ne.s32.totalorder %s1408_s23, %s1089_s8  ;;  %s1094_s21 = scalar_lea.hbm %s1545_s0, 256 }
  0x60   : > { %p1095_p1 = scmp.lt.u32.totalorder %s1408_s23, %s1545_s0  ;;  %p1096_p2 = scmp.lt.u32.totalorder %s1094_s21, %s1089_s8 }
  0x61   : > { %p1092_p12 = pnand %p1091_p9, %p1090_p7  ;;  %p1098_p8 = scmp.lt.u32.totalorder %s1089_s8, %s1408_s23 }
  0x62   : > { %p1097_p4 = por %p1096_p2, %p1095_p1 }
  0x63   : > { %p1093_p0 = pneg %p1092_p12 }
  0x64   : > { %p1099_p13 = por %p1098_p8, %p1097_p4 }
  0x66   : > { %p1100_p6 = pnand %p1099_p13, %p1093_p0 }
  0x68   : > { %1103 = shalt.err (!%p1100_p6)
}
  0x69   : > { %s1104_s20 = scalar_lea.vmem %s1414_s10, 128  ;;  %s1200_s15 = smov [#allocation2]  }
  0x6a   : > { %p1105_p10 = scmp.ne.s32.totalorder %s1414_s10, %s1104_s20  ;;  %s1109_s29 = sshll.u32 %s1200_s15, 4  ;;  %s1110_s29 = int_to_ptr.vmem [resolvable:$false] %s1109_s29 }
  0x6b   : > { %s1111_s12 = scalar_lea.vmem %s1110_s29, 256  ;;  %p1112_p12 = scmp.lt.s32.totalorder %s1414_s10, %s1110_s29 }
  0x6c   : > { %p1107_p3 = pnand %p1105_p10, %p1091_p9  ;;  %p1113_p1 = scmp.lt.s32.totalorder %s1111_s12, %s1104_s20 }
  0x6e   : > { %p1108_p7 = pneg %p1107_p3  ;;  %p1114_p2 = por %p1113_p1, %p1112_p12 }
  0x70   : > { %p1115_p4 = pnand %p1114_p2, %p1108_p7 }
  0x72   : > { %1118 = shalt.err (!%p1115_p4)
}
  0x73   : > { %952 = dma.hbm_to_vmem [thread:$0]  (!%p1410_p11), %s1408_s23, 128, %s1414_s10, %s270_s14  }
  0x74   : > { %p1566_p0 = scmp.ne.s32.totalorder %s1560_s9, 0 }
  0x75   : > { %s1444_s8 = sand.u32 (!%p1566_p0), 1, %s1185_s25   ;;  %p1567_p9 = scmp.ne.s32.totalorder (!%p1566_p0), %s1557_s30, 0 }
  0x76   : > { %289 = sbr.rel (%p1566_p0) target bundleno = 806 (0x326), region = 48  ;;  %s736_s17 = sshll.u32 (!%p1566_p0), %s1444_s8, 3 }
  0x77   : > { %s292_s21 = scalar_lea.sflag (!%p1566_p0), [#allocation3], %s1444_s8  ;;  %s1450_s16 = scalar_lea.vmem (!%p1566_p0), [#allocation2], %s736_s17 }
  0x7d   : > { %1164 = dma.done.wait (%p1567_p9), %s292_s21, 128  }
  0x7e   : > { %1166 = vsyncadd (%p1567_p9), %s292_s21, 4294967168  ;;  %p1568_p11 = scmp.eq.s32.totalorder %s1266_s28, 0 }
  0x80   : > { %1168 = dma.done.wait (%p1568_p11), [#allocation6], 2560   ;;  %p1569_p8 = pmov %p1568_p11 }
  0x82   : > { %1170 = vsyncadd (%p1569_p8), [#allocation6], 4294964736  ;;  %p1570_p13 = pmov %p1569_p8 }
  0x83   : > { %p1571_p6 = pmov %p1569_p8 }
  0x84   : > { %1172 = dma.done.wait (%p1570_p13), [#allocation9], 2048  }
  0x85   : > { %1174 = vsyncadd (%p1571_p6), [#allocation9], 4294965248  ;;  %v1201_v0 = vmov 0.0|0.0   ;;  %vm1202_vm0 = vmmov 0   ;;  %v1203_v1 = vmov 0.0   ;;  %v339_v2 = vld [vmem:[#allocation5] sm:$0xff] }
  0x86   : > { %869 = vmatprep.subr.bf16.mxu0 %v1201_v0  ;;  %796 = vmatprep.mubr.msk.f32.mxu0 %vm1202_vm0, %v1203_v1  ;;  %v340_v3 = vld [vmem:[#allocation5 + $0x8] sm:$0xff]  ;;  %v341_v4 = vld [vmem:[#allocation5 + $0x10] sm:$0xff]  ;;  %v342_v6 = vld [vmem:[#allocation5 + $0x18] sm:$0xff]  ;;  %vm350_vm1 = vcmask 261120   ;;  %s746_s13 = sshll.u32 %s1266_s28, 7  ;;  %s337_s20 = scalar_lea.vmem [#allocation10], %s736_s17 }
  0x87   : > { %875 = vmatprep.subr.bf16.mxu1 %v1201_v0  ;;  %831 = vmatprep.mubr.msk.f32.mxu1 %vm1202_vm0, %v1203_v1  ;;  %v870_v5 = vpack.c.bf16 %v340_v3, %v339_v2  ;;  %v425_v7 = vld [vmem:[#allocation7] sm:$0xff]  ;;  %v426_v8 = vld [vmem:[#allocation7 + $0x8] sm:$0xff]  ;;  %v427_v9 = vld [vmem:[#allocation7 + $0x10] sm:$0xff]  ;;  %v873_v11 = vpack.c.bf16 %v342_v6, %v341_v4  ;;  %s628_s15 = sshll.u32 %s337_s20, 4  ;;  %s1501_s21 = scalar_lea.hbm %s1552_s7, %s746_s13  ;;  %s1503_s15 = int_to_ptr.vmem [resolvable:$true] %s628_s15 }
  0x88   : > { %v428_v10 = vld [vmem:[#allocation7 + $0x18] sm:$0xff]  ;;  %v876_v12 = vpack.c.bf16 %v426_v8, %v425_v7  ;;  %v429_v14 = vld [vmem:[#allocation7 + $0x20] sm:$0xff]  ;;  %v430_v15 = vld [vmem:[#allocation7 + $0x28] sm:$0xff]  ;;  %s1119_s30 = scalar_lea.vmem %s1503_s15, 128  ;;  %s1204_s28 = smov [#allocation10]  }
  0x89   : > { %871 = vmatpush3.bf16.msra.mxu0 %v870_v5  ;;  %v879_v13 = vpack.c.bf16 %v428_v10, %v427_v9  ;;  %v338_v16 = vld [vmem:[%s1450_s16] sm:$0xff]  ;;  %v882_v17 = vpack.c.bf16 %v430_v15, %v429_v14  ;;  %v433_v21 = vld [vmem:[#allocation7 + $0x40] sm:$0xff]  ;;  %v434_v22 = vld [vmem:[#allocation7 + $0x48] sm:$0xff]  ;;  %s615_s16 = scalar_lea.sflag [#allocation4], %s1444_s8  ;;  %p1120_p10 = scmp.ne.s32.totalorder %s1503_s15, %s1119_s30 }
  0x8a   : > { %872 = vmatprep.subr.bf16.mxu0 %v1201_v0  ;;  %877 = vmatpush3.bf16.msra.mxu1 %v876_v12  ;;  %v431_v18 = vld [vmem:[#allocation7 + $0x30] sm:$0xff]  ;;  %v432_v19 = vld [vmem:[#allocation7 + $0x38] sm:$0xff]  ;;  %v888_v23 = vpack.c.bf16 %v434_v22, %v433_v21  ;;  %v437_v27 = vld [vmem:[#allocation7 + $0x60] sm:$0xff]  ;;  %s1123_s17 = sshll.u32 %s1204_s28, 4  ;;  %s1124_s17 = int_to_ptr.vmem [resolvable:$false] %s1123_s17 }
  0x8b   : > { %878 = vmatprep.subr.bf16.mxu1 %v1201_v0  ;;  %v885_v20 = vpack.c.bf16 %v432_v19, %v431_v18  ;;  %v435_v24 = vld [vmem:[#allocation7 + $0x50] sm:$0xff]  ;;  %v436_v25 = vld [vmem:[#allocation7 + $0x58] sm:$0xff]  ;;  %v438_v28 = vld [vmem:[#allocation7 + $0x68] sm:$0xff]  ;;  %p1121_p3 = pnand %p1120_p10, %p1399_p5  ;;  %s1125_s9 = scalar_lea.vmem %s1124_s17, 256 }
  0x8c   : > { %v891_v26 = vpack.c.bf16 %v436_v25, %v435_v24  ;;  %v894_v29 = vpack.c.bf16 %v438_v28, %v437_v27  ;;  %v439_v30 = vld [vmem:[#allocation7 + $0x70] sm:$0xff]  ;;  %v440_v31 = vld [vmem:[#allocation7 + $0x78] sm:$0xff]  ;;  %v519_v33 = vld [vmem:[#allocation8] sm:$0xff]  ;;  %p1126_p12 = scmp.lt.s32.totalorder %s1503_s15, %s1124_s17  ;;  %p1127_p1 = scmp.lt.s32.totalorder %s1125_s9, %s1119_s30 }
  0x8d   : > { %874 = vmatpush3.bf16.msra.mxu0 %v873_v11  ;;  %v897_v32 = vpack.c.bf16 %v440_v31, %v439_v30  ;;  %v520_v34 = vld [vmem:[#allocation8 + $0x8] sm:$0xff]  ;;  %v521_v35 = vld [vmem:[#allocation8 + $0x10] sm:$0xff]  ;;  %v522_v37 = vld [vmem:[#allocation8 + $0x18] sm:$0xff]  ;;  %p1122_p7 = pneg %p1121_p3 }
  0x8e   : > { %899 = vmatprep.subr.bf16.mxu0 %v1201_v0  ;;  %880 = vmatpush3.bf16.msra.mxu1 %v879_v13  ;;  %v900_v36 = vpack.c.bf16 %v520_v34, %v519_v33  ;;  %v903_v38 = vpack.c.bf16 %v522_v37, %v521_v35  ;;  %v523_v39 = vld [vmem:[#allocation8 + $0x20] sm:$0xff]  ;;  %v524_v40 = vld [vmem:[#allocation8 + $0x28] sm:$0xff]  ;;  %v525_v42 = vld [vmem:[#allocation8 + $0x30] sm:$0xff]  ;;  %p1128_p2 = por %p1127_p1, %p1126_p12 }
  0x8f   : > { %881 = vmatprep.subr.bf16.mxu1 %v1201_v0  ;;  %v906_v41 = vpack.c.bf16 %v524_v40, %v523_v39  ;;  %v526_v43 = vld [vmem:[#allocation8 + $0x38] sm:$0xff]  ;;  %v527_v45 = vld [vmem:[#allocation8 + $0x40] sm:$0xff]  ;;  %v528_v46 = vld [vmem:[#allocation8 + $0x48] sm:$0xff] }
  0x90   : > { %797 = vmatmul.mubr.msk.f32.vlgmr.msra.gmra.mrb[0].mxu0 %vm350_vm1, %v338_v16  ;;  %v909_v44 = vpack.c.bf16 %v526_v43, %v525_v42  ;;  %v912_v47 = vpack.c.bf16 %v528_v46, %v527_v45  ;;  %v529_v48 = vld [vmem:[#allocation8 + $0x50] sm:$0xff]  ;;  %v530_v49 = vld [vmem:[#allocation8 + $0x58] sm:$0xff]  ;;  %v531_v51 = vld [vmem:[#allocation8 + $0x60] sm:$0xff]  ;;  %p1129_p4 = pnand %p1128_p2, %p1122_p7 }
  0x91   : > { %866 = vmatprep.mubr.msk.f32.mxu0 %vm1202_vm0, %v1203_v1  ;;  %901 = vmatpush3.bf16.msra.mxu0 %v900_v36  ;;  %v915_v50 = vpack.c.bf16 %v530_v49, %v529_v48  ;;  %v532_v52 = vld [vmem:[#allocation8 + $0x68] sm:$0xff]  ;;  %v741_v54 = vld [vmem:[%s1547_s2] ss:$0 sm:$0xff]  ;;  %v534_v60 = vld [vmem:[#allocation8 + $0x78] sm:$0xff] }
  0x92   : > { %883 = vmatpush3.bf16.msra.mxu1 %v882_v17  ;;  %902 = vmatprep.subr.bf16.mxu0 %v1201_v0  ;;  %v918_v53 = vpack.c.bf16 %v532_v52, %v531_v51  ;;  %v533_v59 = vld [vmem:[#allocation8 + $0x70] sm:$0xff] }
  0x93   : > { %884 = vmatprep.subr.bf16.mxu1 %v1201_v0  ;;  %v921_v61 = vpack.c.bf16 %v534_v60, %v533_v59  ;;  %v743_v62 = vld [vmem:[%s1549_s4] ss:$0 sm:$0xff] }
  0x94   : > { %v744_v3 = vld [vmem:[%s1551_s6] ss:$0 sm:$0xff] }
  0x95   : > { %904 = vmatpush3.bf16.msra.mxu0 %v903_v38 }
  0x96   : > { %886 = vmatpush3.bf16.msra.mxu1 %v885_v20  ;;  %905 = vmatprep.subr.bf16.mxu0 %v1201_v0 }
  0x97   : > { %887 = vmatprep.subr.bf16.mxu1 %v1201_v0 }
  0x99   : > { %907 = vmatpush3.bf16.msra.mxu0 %v906_v41 }
  0x9a   : > { %889 = vmatpush3.bf16.msra.mxu1 %v888_v23  ;;  %908 = vmatprep.subr.bf16.mxu0 %v1201_v0 }
  0x9b   : > { %890 = vmatprep.subr.bf16.mxu1 %v1201_v0 }
  0x9d   : > { %910 = vmatpush3.bf16.msra.mxu0 %v909_v44 }
  0x9e   : > { %892 = vmatpush3.bf16.msra.mxu1 %v891_v26  ;;  %911 = vmatprep.subr.bf16.mxu0 %v1201_v0 }
  0x9f   : > { %893 = vmatprep.subr.bf16.mxu1 %v1201_v0 }
  0xa1   : > { %913 = vmatpush3.bf16.msra.mxu0 %v912_v47 }
  0xa2   : > { %895 = vmatpush3.bf16.msra.mxu1 %v894_v29  ;;  %914 = vmatprep.subr.bf16.mxu0 %v1201_v0 }
  0xa3   : > { %896 = vmatprep.subr.bf16.mxu1 %v1201_v0 }
  0xa5   : > { %916 = vmatpush3.bf16.msra.mxu0 %v915_v50 }
  0xa6   : > { %898 = vmatpush3.bf16.msra.mxu1 %v897_v32  ;;  %917 = vmatprep.subr.bf16.mxu0 %v1201_v0 }
  0xa9   : > { %919 = vmatpush3.bf16.msra.mxu0 %v918_v53 }
  0xaa   : > { %920 = vmatprep.subr.bf16.mxu0 %v1201_v0 }
  0xad   : > { %922 = vmatpush3.bf16.msra.mxu0 %v921_v61 }
 0x163   : > { %v420_v55 = vpop.f32.mrb[0].mxu0 }
 0x164   : > { %v421_v56 = vadd.f32 %v741_v54, %v420_v55  ;;  %v798_v57 = vpop.f32.mrb[1].mxu0 }
 0x166   : > { %v424_v58 = vmax.f32 %v421_v56, 0.0 }
 0x168   : > { %832 = vmatmul.mubr.f32.vlgmr.msra.gmra.mrb[0].mxu1 %v424_v58 }
 0x23b   : > { %v514_v63 = vpop.f32.mrb[0].mxu1 }
 0x23c   : > { %v515_v0 = vadd.f32 %v743_v62, %v514_v63  ;;  %v833_v1 = vpop.f32.mrb[1].mxu1 }
 0x23e   : > { %v518_v2 = vmax.f32 %v515_v0, 0.0 }
 0x240   : > { %867 = vmatmul.mubr.f32.vlgmr.msra.gmra.mrb[2].mxu0 %v518_v2 }
 0x313   : > { %v608_v4 = vpop.f32.mrb[2].mxu0 }
 0x314   : > { %v609_v5 = vadd.f32 %v744_v3, %v608_v4  ;;  %v868_v6 = vpop.f32.mrb[3].mxu0 }
 0x316   : > { %v612_v7 = vmax.f32 %v609_v5, 0.0 }
 0x318   : > { %613 = vst [vmem:[%s337_s20] sm:$0xff] %v612_v7 }
 0x319   : > { %1132 = shalt.err (!%p1129_p4)
}
 0x31a   : > { %s1133_s8 = scalar_lea.hbm %s1501_s21, 128  ;;  %s1137_s11 = scalar_lea.hbm %s1552_s7, 256 }
 0x31b   : > { %p1134_p0 = scmp.ne.s32.totalorder %s1501_s21, %s1133_s8  ;;  %p1138_p8 = scmp.lt.u32.totalorder %s1501_s21, %s1552_s7 }
 0x31c   : > { %p1139_p13 = scmp.lt.u32.totalorder %s1137_s11, %s1133_s8  ;;  %p1141_p10 = scmp.lt.u32.totalorder %s1133_s8, %s1501_s21 }
 0x31d   : > { %p1135_p9 = pnand %p1134_p0, %p1399_p5 }
 0x31e   : > { %p1140_p6 = por %p1139_p13, %p1138_p8 }
 0x31f   : > { %p1136_p11 = pneg %p1135_p9 }
 0x320   : > { %p1142_p3 = por %p1141_p10, %p1140_p6 }
 0x322   : > { %p1143_p7 = pnand %p1142_p3, %p1136_p11 }
 0x324   : > { %1146 = shalt.err (!%p1143_p7)
}
 0x325   : > { %937 = dma.vmem_to_hbm [thread:$0]  (%p1399_p5), %s1503_s15, 128, %s1501_s21, %s615_s16  }
 0x326 PF: > { %s1572_s20 = sld [smem:[#allocation15_spill]]  ;;  %s640_s29 = sand.u32 1, %s1181_s24  }
 0x327   : > { %p1574_p1 = scmp.ge.s32.totalorder %s1193_s27, 2  ;;  %s641_s12 = scalar_lea.sflag [#allocation4], %s640_s29 }
 0x32c   : > { %p1573_p12 = scmp.ne.s32.totalorder %s1572_s20, 0 }
 0x32e   : > { %p954_p2 = pnand %p1574_p1, %p1573_p12 }
 0x330   : > { %1176 = dma.done.wait (!%p954_p2), %s641_s12, 128  }
 0x331   : > { %1178 = vsyncadd (!%p954_p2), %s641_s12, 4294967168  ;;  %p22_p4 = scmp.ge.s32.totalorder %s1385_s22, 4   ;;  %s1575_s24 = smov %s1185_s25 }
 0x332   : > { %s1576_s25 = smov %s1189_s26  ;;  %s1577_s26 = smov %s1395_s18 }
 0x333   : > { %s1578_s27 = smov %s1385_s22  ;;  %24 = sbr.rel (!%p22_p4) target bundleno = 7 (0x7), region = 105 }
 0x33a   :  { %646 = vsyncpa [#allocation3], 1 }
 0x33b   :  { %648 = vsyncpa [#allocation3 + $0x1], 1 }
 0x33c   :  { %649 = vsyncpa [#allocation6], 1 }
 0x33d   :  { %650 = vsyncpa [#allocation9], 1 }
 0x33e   :  { %651 = vsyncpa [#allocation4], 1 }
 0x33f   :  { %653 = vsyncpa [#allocation4 + $0x1], 1 }

</bundles_post_ra>
